<compile_context>
chip_gen: v7x
topology: tpu7x:2x2x1
jax: 0.10.0
libtpu: 0.0.40
codegen_flags: <defaults>
</compile_context>

<pallas_src>
import jax
import jax.numpy as jnp
from jax.experimental import pallas as pl
from jax.experimental.pallas import tpu as pltpu


def _round_up(x, m):
    return ((x + m - 1) // m) * m


def ffn_kernel(x_ref, w1_ref, b1_ref, w2_ref, b2_ref, o_ref):
    # x_ref: (ed, TP) channel-major pixel tile (channels on sublanes, pixels
    # on lanes).  Native dtype fed straight to the MXU (no upcast pass).
    x = x_ref[...]

    # pw1: 1x1 conv (BN1 scale folded into W1') -> f32 accumulate, shift, ReLU
    h = jnp.dot(w1_ref[...], x, preferred_element_type=jnp.float32)   # (hdim, TP) f32
    h = jnp.maximum(h + b1_ref[...], 0.0)
    h = h.astype(w2_ref.dtype)                                        # MXU input dtype

    # pw2: 1x1 conv (BN2 scale folded into W2') -> f32 accumulate, shift
    y = jnp.dot(w2_ref[...], h, preferred_element_type=jnp.float32)   # (ed, TP) f32
    o_ref[...] = (y + b2_ref[...]).astype(o_ref.dtype)


def _select_tile(HW, B, ed, hdim, x_bytes, out_bytes, thw_tile, vmem_budget_bytes):
    """Pick a lane-aligned pixel tile under the VMEM budget, >= 2 grid steps."""
    # Per-pixel VMEM footprint: double-buffered x and out blocks + f32 temps.
    per_pixel = 2 * ed * x_bytes + 2 * ed * out_bytes + 4 * (hdim + ed)
    cap = max(128, (vmem_budget_bytes // per_pixel) // 128 * 128)
    cap = min(cap, max(128, (thw_tile // 128) * 128))

    if HW <= cap:
        tile, num_tiles = HW, 1          # full pixel axis == full array dim (legal)
    else:
        num_tiles = pl.cdiv(HW, cap)
        tile = _round_up(pl.cdiv(HW, num_tiles), 128)
        num_tiles = pl.cdiv(HW, tile)

    # Keep >= 2 parallel grid steps so both v7x TensorCores get work.
    if B * num_tiles < 2 and HW >= 256:
        tile = _round_up(pl.cdiv(HW, 2), 128)
        num_tiles = pl.cdiv(HW, tile)

    return tile, num_tiles, per_pixel


def ffn_pallas(x_nchw, w1t, b1c, w2t, b2c, *, thw_tile=32768,
               vmem_budget_bytes=24 << 20):
    """FFN forward.

    x_nchw: (B, ed, H, W) input (NCHW, as in PyTorch); f32 or bf16.
    w1t:    (hdim, ed) = (W1 * bn1_scale).T   (BN scale folded into weights)
    b1c:    (hdim, 1)  bn1 shift (f32)
    w2t:    (ed, hdim) = (W2 * bn2_scale).T
    b2c:    (ed, 1)    bn2 shift (f32)
    """
    B, ed, H, W = x_nchw.shape
    hdim = w1t.shape[0]
    HW = H * W

    # Channel-major flatten: (B, ed, H*W).  Free reshape, no HBM transpose.
    x3 = x_nchw.reshape(B, ed, HW)

    x_bytes = jnp.dtype(x_nchw.dtype).itemsize
    out_bytes = x_bytes
    tile, num_tiles, per_pixel = _select_tile(
        HW, B, ed, hdim, x_bytes, out_bytes, thw_tile, vmem_budget_bytes)

    # VMEM limit with headroom (stays below v7x's 64 MiB physical VMEM).
    w_bytes = (w1t.size * jnp.dtype(w1t.dtype).itemsize
               + w2t.size * jnp.dtype(w2t.dtype).itemsize
               + (b1c.size + b2c.size) * 4)
    vmem_est = per_pixel * tile + 2 * w_bytes
    vmem_limit = int(min(64 << 20, max(32 << 20, 2 * vmem_est)))

    cost = pl.CostEstimate(
        flops=4 * B * HW * ed * hdim,                      # two matmuls
        transcendentals=0,
        bytes_accessed=B * ed * HW * (x_bytes + out_bytes) + w_bytes)

    grid = (B, num_tiles)
    out = pl.pallas_call(
        ffn_kernel,
        out_shape=jax.ShapeDtypeStruct((B, ed, HW), x_nchw.dtype),
        grid_spec=pltpu.PrefetchScalarGridSpec(
            num_scalar_prefetch=0,
            grid=grid,
            in_specs=[
                pl.BlockSpec((None, ed, tile), lambda b, j: (b, 0, j)),  # x tile
                pl.BlockSpec((hdim, ed), lambda b, j: (0, 0)),           # W1' (resident)
                pl.BlockSpec((hdim, 1), lambda b, j: (0, 0)),            # BN1 shift
                pl.BlockSpec((ed, hdim), lambda b, j: (0, 0)),           # W2' (resident)
                pl.BlockSpec((ed, 1), lambda b, j: (0, 0)),              # BN2 shift
            ],
            out_specs=pl.BlockSpec((None, ed, tile), lambda b, j: (b, 0, j)),
        ),
        compiler_params=pltpu.CompilerParams(
            dimension_semantics=("parallel", "parallel"),
            vmem_limit_bytes=vmem_limit),
        cost_estimate=cost,
    )(x3, w1t, b1c, w2t, b2c)

    return out.reshape(B, ed, H, W)


def fuse_bn(gamma, beta, mean, var, eps=1e-5):
    scale = gamma / jnp.sqrt(var + eps)
    shift = beta - mean * scale
    return scale.reshape(1, -1), shift.reshape(1, -1)


def prepare_params(w1, s1, b1, w2, s2, b2, dtype=jnp.float32):
    """Fold BN scales into conv weights, transpose to channel-major."""
    w1t = (w1 * s1).T.astype(dtype)    # (hdim, ed)
    w2t = (w2 * s2).T.astype(dtype)    # (ed, hdim)
    return w1t, b1.reshape(-1, 1).astype(jnp.float32), \
        w2t, b2.reshape(-1, 1).astype(jnp.float32)


def ffn_reference(x_nchw, w1, s1, b1, w2, s2, b2):
    B, ed, H, W = x_nchw.shape
    xf = jnp.transpose(x_nchw, (0, 2, 3, 1)).reshape(-1, ed).astype(jnp.float32)
    h = jnp.maximum(xf @ w1 * s1 + b1, 0.0)
    y = h @ w2 * s2 + b2
    return jnp.transpose(y.reshape(B, H, W, ed), (0, 3, 1, 2))


if __name__ == "__main__":
    key = jax.random.PRNGKey(0)
    B, ed, hdim = 2, 16, 32        # small shapes consistent with the module

    ks = jax.random.split(key, 13)

    # Conv weights (PyTorch conv weight is (out, in, 1, 1); stored here as
    # (in, out) so the reference does x @ W directly; the wrapper folds BN
    # scale and transposes to channel-major for the kernel).
    w1 = jax.random.normal(ks[1], (ed, hdim), dtype=jnp.float32) * 0.1
    w2 = jax.random.normal(ks[2], (hdim, ed), dtype=jnp.float32) * 0.1

    # BatchNorm params (eval-mode fold).  NOTE: the literal fresh-init
    # constants of the module (gamma2 = 0 via bn_weight_init=0, running stats
    # 0/1) make the output identically zero, so synthetic BN params exercise
    # a non-degenerate path.
    # TODO(synk): training-mode BatchNorm (batch-statistics update) is not
    # implemented; kernel uses the eval-mode affine fold (as Conv2d_BN.fuse).
    g1 = 1.0 + 0.1 * jax.random.normal(ks[3], (hdim,), dtype=jnp.float32)
    be1 = 0.1 * jax.random.normal(ks[4], (hdim,), dtype=jnp.float32)
    m1 = 0.1 * jax.random.normal(ks[5], (hdim,), dtype=jnp.float32)
    v1 = jnp.abs(jax.random.normal(ks[6], (hdim,), dtype=jnp.float32)) + 0.5
    g2 = 1.0 + 0.1 * jax.random.normal(ks[7], (ed,), dtype=jnp.float32)
    be2 = 0.1 * jax.random.normal(ks[8], (ed,), dtype=jnp.float32)
    m2 = 0.1 * jax.random.normal(ks[9], (ed,), dtype=jnp.float32)
    v2 = jnp.abs(jax.random.normal(ks[10], (ed,), dtype=jnp.float32)) + 0.5

    s1, b1 = fuse_bn(g1, be1, m1, v1)
    s2, b2 = fuse_bn(g2, be2, m2, v2)
    w1t, b1c, w2t, b2c = prepare_params(w1, s1, b1, w2, s2, b2)

    # Case 1: H*W multiple of 128 (single exact tile per image, f32 path).
    x = jax.random.normal(ks[0], (B, ed, 16, 16), dtype=jnp.float32)
    out = jax.block_until_ready(ffn_pallas(x, w1t, b1c, w2t, b2c))
    ref = ffn_reference(x, w1, s1, b1, w2, s2, b2)
    assert out.shape == x.shape
    assert jnp.allclose(out, ref, atol=1e-3, rtol=1e-3), "mismatch vs reference"

    # Case 2: ragged H*W smaller than a lane tile (tile == full pixel axis).
    x2 = jax.random.normal(ks[11], (B, ed, 10, 10), dtype=jnp.float32)
    out2 = jax.block_until_ready(ffn_pallas(x2, w1t, b1c, w2t, b2c))
    ref2 = ffn_reference(x2, w1, s1, b1, w2, s2, b2)
    assert out2.shape == x2.shape
    assert jnp.allclose(out2, ref2, atol=1e-3, rtol=1e-3), "mismatch (ragged)"

    # Case 3: forced multi-tile with a partial (masked) last pixel block.
    x3 = jax.random.normal(ks[12], (B, ed, 15, 15), dtype=jnp.float32)
    out3 = jax.block_until_ready(ffn_pallas(x3, w1t, b1c, w2t, b2c, thw_tile=128))
    ref3 = ffn_reference(x3, w1, s1, b1, w2, s2, b2)
    assert out3.shape == x3.shape
    assert jnp.allclose(out3, ref3, atol=1e-3, rtol=1e-3), "mismatch (partial block)"

    # Case 4: bf16 activations + bf16 folded weights (halved HBM traffic).
    w1b, b1b, w2b, b2b = prepare_params(w1, s1, b1, w2, s2, b2, dtype=jnp.bfloat16)
    xb = x.astype(jnp.bfloat16)
    outb = jax.block_until_ready(ffn_pallas(xb, w1b, b1b, w2b, b2b))
    assert outb.dtype == jnp.bfloat16
    assert jnp.allclose(outb.astype(jnp.float32), ref, atol=5e-2, rtol=5e-2), \
        "mismatch (bf16)"

    print("KERNEL_OK")
</pallas_src>

<mosaic_0001>
module attributes {stable_mosaic.version = 11 : i64} {
  func.func @ffn_kernel(%arg0: i32, %arg1: i32, %arg2: memref<1x16x256xf32, #tpu.memory_space<vmem>>, %arg3: memref<32x16xf32, #tpu.memory_space<vmem>>, %arg4: memref<32x1xf32, #tpu.memory_space<vmem>>, %arg5: memref<16x32xf32, #tpu.memory_space<vmem>>, %arg6: memref<16x1xf32, #tpu.memory_space<vmem>>, %arg7: memref<1x16x256xf32, #tpu.memory_space<vmem>>) attributes {dimension_semantics = [#tpu.dimension_semantics<parallel>, #tpu.dimension_semantics<parallel>], iteration_bounds = array<i64: 2, 1>, scalar_prefetch = 0 : i64, scratch_operands = 0 : i64, tpu.core_type = #tpu.core_type<tc>, window_params = [{transform_indices = @transform_0, window_bounds = array<i64: 1, 16, 256>}, {pipeline_mode = #tpu.pipeline_mode<synchronous>, transform_indices = @transform_1, window_bounds = array<i64: 32, 16>}, {pipeline_mode = #tpu.pipeline_mode<synchronous>, transform_indices = @transform_2, window_bounds = array<i64: 32, 1>}, {pipeline_mode = #tpu.pipeline_mode<synchronous>, transform_indices = @transform_3, window_bounds = array<i64: 16, 32>}, {pipeline_mode = #tpu.pipeline_mode<synchronous>, transform_indices = @transform_4, window_bounds = array<i64: 16, 1>}, {transform_indices = @transform_5, window_bounds = array<i64: 1, 16, 256>}]} {
    %c0 = arith.constant 0 : index
    %c0_0 = arith.constant 0 : index
    %c0_1 = arith.constant 0 : index
    %0 = vector.load %arg2[%c0, %c0_0, %c0_1] : memref<1x16x256xf32, #tpu.memory_space<vmem>>, vector<1x16x256xf32>
    %1 = vector.shape_cast %0 : vector<1x16x256xf32> to vector<16x256xf32>
    %c0_2 = arith.constant 0 : index
    %c0_3 = arith.constant 0 : index
    %2 = vector.load %arg3[%c0_2, %c0_3] : memref<32x16xf32, #tpu.memory_space<vmem>>, vector<32x16xf32>
    %cst = arith.constant dense<0.000000e+00> : vector<32x256xf32>
    %3 = tpu.matmul %2, %1, %cst {dimension_numbers = #tpu.dot_dimension_numbers<[1], [0], [0], [1], [0, 0, 1, 1], [], []>} : vector<32x16xf32>, vector<16x256xf32>, vector<32x256xf32> -> vector<32x256xf32>
    %c0_4 = arith.constant 0 : index
    %c0_5 = arith.constant 0 : index
    %4 = vector.load %arg4[%c0_4, %c0_5] : memref<32x1xf32, #tpu.memory_space<vmem>>, vector<32x1xf32>
    %5 = vector.broadcast %4 : vector<32x1xf32> to vector<32x256xf32>
    %6 = arith.addf %3, %5 : vector<32x256xf32>
    %cst_6 = arith.constant 0.000000e+00 : f32
    %7 = vector.broadcast %cst_6 : f32 to vector<32x256xf32>
    %8 = arith.maximumf %6, %7 : vector<32x256xf32>
    %c0_7 = arith.constant 0 : index
    %c0_8 = arith.constant 0 : index
    %9 = vector.load %arg5[%c0_7, %c0_8] : memref<16x32xf32, #tpu.memory_space<vmem>>, vector<16x32xf32>
    %cst_9 = arith.constant dense<0.000000e+00> : vector<16x256xf32>
    %10 = tpu.matmul %9, %8, %cst_9 {dimension_numbers = #tpu.dot_dimension_numbers<[1], [0], [0], [1], [0, 0, 1, 1], [], []>} : vector<16x32xf32>, vector<32x256xf32>, vector<16x256xf32> -> vector<16x256xf32>
    %c0_10 = arith.constant 0 : index
    %c0_11 = arith.constant 0 : index
    %11 = vector.load %arg6[%c0_10, %c0_11] : memref<16x1xf32, #tpu.memory_space<vmem>>, vector<16x1xf32>
    %12 = vector.broadcast %11 : vector<16x1xf32> to vector<16x256xf32>
    %13 = arith.addf %10, %12 : vector<16x256xf32>
    %c0_12 = arith.constant 0 : index
    %c0_13 = arith.constant 0 : index
    %c0_14 = arith.constant 0 : index
    %14 = vector.load %arg7[%c0_12, %c0_13, %c0_14] : memref<1x16x256xf32, #tpu.memory_space<vmem>>, vector<1x16x256xf32>
    %15 = vector.shape_cast %14 : vector<1x16x256xf32> to vector<16x256xf32>
    %16 = vector.shape_cast %13 : vector<16x256xf32> to vector<1x16x256xf32>
    tpu.vector_store %arg7[%c0_12, %c0_13, %c0_14], %16 {strides = array<i32>} : memref<1x16x256xf32, #tpu.memory_space<vmem>>, vector<1x16x256xf32>,
    return
  }
  func.func @transform_0(%arg0: i32, %arg1: i32) -> (i32, i32, i32) {
    %c0_i32 = arith.constant 0 : i32
    %c0_i32_0 = arith.constant 0 : i32
    return %arg0, %c0_i32, %arg1 : i32, i32, i32
  }
  func.func @transform_1(%arg0: i32, %arg1: i32) -> (i32, i32) {
    %c0_i32 = arith.constant 0 : i32
    %c0_i32_0 = arith.constant 0 : i32
    %c0_i32_1 = arith.constant 0 : i32
    return %c0_i32, %c0_i32_0 : i32, i32
  }
  func.func @transform_2(%arg0: i32, %arg1: i32) -> (i32, i32) {
    %c0_i32 = arith.constant 0 : i32
    %c0_i32_0 = arith.constant 0 : i32
    %c0_i32_1 = arith.constant 0 : i32
    return %c0_i32, %c0_i32_0 : i32, i32
  }
  func.func @transform_3(%arg0: i32, %arg1: i32) -> (i32, i32) {
    %c0_i32 = arith.constant 0 : i32
    %c0_i32_0 = arith.constant 0 : i32
    %c0_i32_1 = arith.constant 0 : i32
    return %c0_i32, %c0_i32_0 : i32, i32
  }
  func.func @transform_4(%arg0: i32, %arg1: i32) -> (i32, i32) {
    %c0_i32 = arith.constant 0 : i32
    %c0_i32_0 = arith.constant 0 : i32
    %c0_i32_1 = arith.constant 0 : i32
    return %c0_i32, %c0_i32_0 : i32, i32
  }
  func.func @transform_5(%arg0: i32, %arg1: i32) -> (i32, i32, i32) {
    %c0_i32 = arith.constant 0 : i32
    %c0_i32_0 = arith.constant 0 : i32
    return %arg0, %c0_i32, %arg1 : i32, i32, i32
  }
}

</mosaic_0001>

<bundles_post_ra>
// kernel: tpu_custom_call.1
= control target key start
LH: loop header
LB: loop body
LE: loop exit
PB: predicated region body
PF: predicated region fallthrough
CT: control target
= control target key end

     0   :  { %10 = vsyncpa [#allocation3], 0  ;;  %s959_s0 = inlined_call_operand.vmem [shape: f32[2,16,256], index: 0, kind: input, shape index: {}]   ;;  %s960_s1 = inlined_call_operand.vmem [shape: f32[32,16], index: 1, kind: input, shape index: {}]   ;;  %s961_s2 = inlined_call_operand.vmem [shape: f32[32,1], index: 2, kind: input, shape index: {}]   ;;  %s962_s3 = inlined_call_operand.vmem [shape: f32[16,32], index: 3, kind: input, shape index: {}]   ;;  %s963_s4 = inlined_call_operand.vmem [shape: f32[16,1], index: 4, kind: input, shape index: {}]   ;;  %s964_s5 = inlined_call_operand.hbm [shape: f32[2,16,256], index: 5, kind: output, shape index: {}]  }
   0x1   :  { %12 = vsyncpa [#allocation3 + $0x1], 0  ;;  %s802_s18 = smov 0   ;;  %s804_s19 = smov 0  }
   0x2   :  { %s806_s20 = smov 0   ;;  %s808_s21 = smov 0  }
   0x3   :  { %s810_s22 = smov 0   ;;  %s812_s23 = smov 0  }
   0x4 LB: > { %s593_s24 = sadd.s32 4294967295, %s765_s23   ;;  %s594_s25 = sadd.s32 4294967294, %s765_s23   ;;  %s765_s23 = sphi %s812_s23, %s18_s23   ;;  %s761_s22 = sphi %s810_s22, %s971_s22   ;;  %s757_s21 = sphi %s808_s21, %s970_s21   ;;  %s753_s20 = sphi %s806_s20, %s969_s20   ;;  %s749_s19 = sphi %s804_s19, %s968_s19   ;;  %s745_s18 = sphi %s802_s18, %s967_s18  }
   0x5   : > { %s30_s26 = sadd.s32 1, %s761_s22  ;;  %s151_s27 = sadd.s32 1, %s753_s20 }
   0x6   : > { %p32_p0 = scmp.ge.s32.totalorder %s30_s26, 2  ;;  %p161_p1 = scmp.ne.s32.totalorder %s753_s20, %s749_s19 }
   0x7   : > { %p162_p2 = scmp.eq.s32.totalorder %s593_s24, 1  ;;  %p167_p3 = scmp.ne.s32.totalorder %s749_s19, %s745_s18 }
   0x8   : > { %s973_s26 = smov (%p32_p0, %s30_s26), 0  ;;  %p168_p5 = scmp.eq.s32.totalorder %s594_s25, 1 }
   0x9   : > { %p842_p4 = por %p162_p2, %p161_p1  ;;  %s146_s29 = ssub.s32 %s761_s22, %s973_s26 }
   0xa   : > { %p597_p6 = scmp.ge.s32.totalorder %s765_s23, 1  ;;  %p149_p7 = scmp.eq.s32.totalorder %s146_s29, 0 }
   0xb   : > { %p849_p8 = por %p168_p5, %p167_p3  ;;  %p211_p9 = scmp.lt.s32.totalorder %s765_s23, 3 }
   0xc   : > { %s855_s6 = scalar_select %p149_p7, %s753_s20, %s151_s27  }
   0xd   : > { %p212_p10 = pnand %p597_p6, %p211_p9 }
   0xe   : > { %p244_p11 = scmp.lt.s32.totalorder (!%p212_p10), %s757_s21, 1  ;;  %v767_v0 = vmov (!%p212_p10), 0.0   ;;  %v262_v1 = vld [vmem:[%s961_s2] sm:$0xff] (!%p212_p10)  ;;  %v264_v2 = vld [vmem:[%s961_s2 + $0x10] sm:$0xff] (!%p212_p10)  ;;  %v768_v3 = vmov (!%p212_p10), 0   ;;  %v263_v4 = vld [vmem:[%s961_s2 + $0x8] sm:$0xff] (!%p212_p10) }
   0xf   : > { %215 = sbr.rel (%p212_p10) target bundleno = 502 (0x1f6), region = 40  ;;  %363 = vmatprep.mubr.f32.mxu0 (!%p212_p10), %v767_v0  ;;  %481 = vmatprep.mubr.f32.mxu1 (!%p212_p10), %v767_v0  ;;  %v265_v5 = vld [vmem:[%s961_s2 + $0x18] sm:$0xff] (!%p212_p10)  ;;  %v398_v12 = vld [vmem:[%s963_s4] sm:$0xff] (!%p212_p10)  ;;  %v399_v13 = vld [vmem:[%s963_s4 + $0x8] sm:$0xff] (!%p212_p10)  ;;  %vm286_vm0 = vcmask (!%p212_p10), 130048   ;;  %vm410_vm1 = vcmask (!%p212_p10), 261120  }
  0x10   : > { %685 = vset.pattern.permute.xlu0 (!%p212_p10), %v768_v3  ;;  %686 = vset.pattern.permute.xlu1 (!%p212_p10), %v768_v3  ;;  %v258_v14 = vld [vmem:[%s960_s1] sm:$0xff] (!%p212_p10)  ;;  %v259_v15 = vld [vmem:[%s960_s1 + $0x8] sm:$0xff] (!%p212_p10)  ;;  %v260_v16 = vld [vmem:[%s960_s1 + $0x10] sm:$0xff] (!%p212_p10)  ;;  %s240_s29 = sand.u32 (!%p212_p10), 1, %s749_s19   ;;  %s613_s10 = sshll.u32 (!%p212_p10), %s757_s21, 9 }
  0x11   : > { %268 = vperm.xlu0 (!%p212_p10), %685, %v262_v1   ;;  %278 = vperm.xlu1 (!%p212_p10), %686, %v264_v2   ;;  %v261_v17 = vld [vmem:[%s960_s1 + $0x18] sm:$0xff] (!%p212_p10)  ;;  %v396_v50 = vld [vmem:[%s962_s3] sm:$0xff] (!%p212_p10)  ;;  %v397_v51 = vld [vmem:[%s962_s3 + $0x8] sm:$0xff] (!%p212_p10)  ;;  %s598_s7 = sshll.u32 (!%p212_p10), %s240_s29, 5  ;;  %s911_s13 = scalar_lea.hbm (!%p212_p10), %s964_s5, %s613_s10 }
  0x12   : > { %s242_s8 = scalar_lea.vmem (!%p212_p10), [#allocation2], %s598_s7  ;;  %s769_s15 = smov (!%p212_p10), [#allocation2]  }
  0x13   : > { %s514_s9 = sshll.u32 (!%p212_p10), %s242_s8, 4  ;;  %s691_s16 = sshll.u32 (!%p212_p10), %s769_s15, 4  ;;  %s906_s9 = int_to_ptr.vmem [resolvable:$true] %s514_s9  ;;  %s692_s16 = int_to_ptr.vmem [resolvable:$false] %s691_s16 }
  0x14   : > { %s687_s14 = scalar_lea.vmem (!%p212_p10), %s906_s9, 512  ;;  %s693_s17 = scalar_lea.vmem (!%p212_p10), %s692_s16, 1024 }
  0x15   : > { %273 = vperm.xlu0 (!%p212_p10), %685, %v263_v4   ;;  %283 = vperm.xlu1 (!%p212_p10), %686, %v265_v5   ;;  %p688_p12 = scmp.ne.s32.totalorder (!%p212_p10), %s906_s9, %s687_s14  ;;  %p694_p1 = scmp.lt.s32.totalorder (!%p212_p10), %s906_s9, %s692_s16 }
  0x16   : > { %s245_s11 = scalar_select %p244_p11, %s757_s21, 1 }
  0x17   : > { %s913_s21 = scalar_lea.sflag [#allocation3], %s240_s29  ;;  %p689_p13 = pnand %p688_p12, %p842_p4 }
  0x18   : > { %s612_s12 = sshll.u32 %s245_s11, 5  ;;  %p695_p2 = scmp.lt.s32.totalorder %s693_s17, %s687_s14 }
  0x19   : > { %s251_s25 = scalar_lea.vmem %s959_s0, %s612_s12  ;;  %402 = vperm.xlu0 %685, %v398_v12   ;;  %407 = vperm.xlu1 %686, %v399_v13   ;;  %p690_p0 = pneg %p689_p13 }
  0x1a   : > { %v255_v6 = vld [vmem:[%s251_s25 + $0x8] sm:$0xff]  ;;  %v257_v7 = vld [vmem:[%s251_s25 + $0x18] sm:$0xff]  ;;  %v254_v8 = vld [vmem:[%s251_s25] sm:$0xff]  ;;  %p696_p3 = por %p695_p2, %p694_p1 }
  0x1b   : > { %v614_v9 = vpack.c.bf16 %v257_v7, %v255_v6  ;;  %v256_v10 = vld [vmem:[%s251_s25 + $0x10] sm:$0xff] }
  0x1c   : > { %v616_v11 = vpack.c.bf16 %v256_v10, %v254_v8  ;;  %p697_p5 = pnand %p696_p3, %p690_p0 }
  0x1d   : > { %615 = vmatprep.subr.bf16.mxu0 %v614_v9 }
  0x1e   : > { %617 = vmatpush1.bf16.msra.mxu0 %v616_v11 }
  0x21   : > { %601 = vmatmul.mubr.msk.f32.vlgmr.msra.gmra.mrb[0].mxu0 %vm286_vm0, %v258_v14 }
  0x22   : > { %369 = vmatprep.mubr.f32.mxu0 %v767_v0 }
  0x25   : > { %602 = vmatmul.mubr.msk.f32.gmra.mrb[2].mxu0 %vm286_vm0, %v259_v15 }
  0x26   : > { %375 = vmatprep.mubr.f32.mxu0 %v767_v0 }
  0x29   : > { %603 = vmatmul.mubr.msk.f32.gmra.mrb[4].mxu0 %vm286_vm0, %v260_v16 }
  0x2a   : > { %381 = vmatprep.mubr.f32.mxu0 %v767_v0 }
  0x2d   : > { %604 = vmatmul.mubr.msk.f32.gmra.mrb[6].mxu0 %vm286_vm0, %v261_v17 }
  0x90   : > { %v269_v18 = vpop.permute.xlu0 %268  ;;  %v279_v27 = vpop.permute.xlu1 %278 }
  0x94   : > { %v274_v22 = vpop.permute.xlu0 %273  ;;  %v284_v38 = vpop.permute.xlu1 %283 }
  0x98   : > { %v403_v52 = vpop.permute.xlu0 %402  ;;  %v408_v57 = vpop.permute.xlu1 %407 }
  0xf4   : > { %v365_v19 = vpop.f32.mrb[0].mxu0 }
  0xf5   : > { %v367_v20 = vpop.f32.mrb[1].mxu0  ;;  %v366_v21 = vadd.f32 %v365_v19, %v269_v18 }
  0xf6   : > { %v368_v23 = vadd.f32 %v367_v20, %v269_v18 }
  0xf7   : > { %v388_v29 = vmax.f32 %v366_v21, 0.0 }
  0xf8   : > { %v371_v24 = vpop.f32.mrb[2].mxu0  ;;  %v389_v31 = vmax.f32 %v368_v23, 0.0 }
  0xf9   : > { %v372_v25 = vadd.f32 %v371_v24, %v274_v22  ;;  %v373_v26 = vpop.f32.mrb[3].mxu0 }
  0xfa   : > { %v374_v28 = vadd.f32 %v373_v26, %v274_v22 }
  0xfb   : > { %v390_v30 = vmax.f32 %v372_v25, 0.0 }
  0xfc   : > { %v391_v32 = vmax.f32 %v374_v28, 0.0  ;;  %v377_v33 = vpop.f32.mrb[4].mxu0 }
  0xfd   : > { %v379_v34 = vpop.f32.mrb[5].mxu0  ;;  %v620_v35 = vpack.c.bf16 %v390_v30, %v388_v29  ;;  %v378_v37 = vadd.f32 %v377_v33, %v279_v27 }
  0xfe   : > { %v618_v36 = vpack.c.bf16 %v391_v32, %v389_v31  ;;  %v380_v39 = vadd.f32 %v379_v34, %v279_v27 }
  0xff   : > { %v392_v44 = vmax.f32 %v378_v37, 0.0 }
 0x100   : > { %v383_v40 = vpop.f32.mrb[6].mxu0  ;;  %619 = vmatprep.subr.bf16.mxu1 %v618_v36  ;;  %v393_v46 = vmax.f32 %v380_v39, 0.0 }
 0x101   : > { %v384_v41 = vadd.f32 %v383_v40, %v284_v38  ;;  %v385_v42 = vpop.f32.mrb[7].mxu0  ;;  %621 = vmatpush1.bf16.msra.mxu1 %v620_v35 }
 0x102   : > { %v386_v43 = vadd.f32 %v385_v42, %v284_v38 }
 0x103   : > { %v394_v45 = vmax.f32 %v384_v41, 0.0 }
 0x104   : > { %v395_v47 = vmax.f32 %v386_v43, 0.0 }
 0x105   : > { %v624_v48 = vpack.c.bf16 %v394_v45, %v392_v44 }
 0x106   : > { %v622_v49 = vpack.c.bf16 %v395_v47, %v393_v46 }
 0x108   : > { %623 = vmatprep.subr.bf16.mxu1 %v622_v49 }
 0x109   : > { %625 = vmatpush1.bf16.msra.mxu1 %v624_v48 }
 0x10c   : > { %605 = vmatmul.mubr.msk.f32.vlgmr.msra.gmra.mrb[0].mxu1 %vm410_vm1, %v396_v50 }
 0x10d   : > { %487 = vmatprep.mubr.f32.mxu1 %v767_v0 }
 0x110   : > { %606 = vmatmul.mubr.msk.f32.gmra.mrb[2].mxu1 %vm410_vm1, %v397_v51 }
 0x1df   : > { %v483_v53 = vpop.f32.mrb[0].mxu1 }
 0x1e0   : > { %v484_v54 = vadd.f32 %v483_v53, %v403_v52  ;;  %v485_v55 = vpop.f32.mrb[1].mxu1 }
 0x1e1   : > { %v486_v56 = vadd.f32 %v485_v55, %v403_v52 }
 0x1e2   : > { %494 = vst [vmem:[%s242_s8] sm:$0xff] %v484_v54 }
 0x1e3   : > { %495 = vst [vmem:[%s242_s8 + $0x8] sm:$0xff] %v486_v56  ;;  %v489_v58 = vpop.f32.mrb[2].mxu1 }
 0x1e4   : > { %v490_v59 = vadd.f32 %v489_v58, %v408_v57  ;;  %v491_v60 = vpop.f32.mrb[3].mxu1 }
 0x1e5   : > { %v492_v61 = vadd.f32 %v491_v60, %v408_v57 }
 0x1e6   : > { %496 = vst [vmem:[%s242_s8 + $0x10] sm:$0xff] %v490_v59 }
 0x1e7   : > { %497 = vst [vmem:[%s242_s8 + $0x18] sm:$0xff] %v492_v61 }
 0x1e8   : > { %700 = shalt.err (!%p697_p5)
}
 0x1e9   : > { %s701_s24 = scalar_lea.hbm %s911_s13, 512  ;;  %s705_s29 = scalar_lea.hbm %s964_s5, 1024 }
 0x1ea   : > { %p702_p6 = scmp.ne.s32.totalorder %s911_s13, %s701_s24  ;;  %p706_p10 = scmp.lt.u32.totalorder %s911_s13, %s964_s5 }
 0x1eb   : > { %p707_p11 = scmp.lt.u32.totalorder %s705_s29, %s701_s24  ;;  %p709_p13 = scmp.lt.u32.totalorder %s701_s24, %s911_s13 }
 0x1ec   : > { %p703_p7 = pnand %p702_p6, %p842_p4 }
 0x1ed   : > { %p708_p12 = por %p707_p11, %p706_p10 }
 0x1ee   : > { %p704_p9 = pneg %p703_p7 }
 0x1ef   : > { %p710_p0 = por %p709_p13, %p708_p12 }
 0x1f1   : > { %p711_p1 = pnand %p710_p0, %p704_p9 }
 0x1f3   : > { %714 = shalt.err (!%p711_p1)
}
 0x1f4   : > { %s770_s10 = smov 256   ;;  %s771_s11 = smov 16  }
 0x1f5   : > { %626 = dma.vmem_to_hbm [thread:$0]  (%p842_p4), %s906_s9, 512, %s911_s13, %s913_s21, %s770_s10, %s770_s10, %s771_s11  }
 0x1f6 PF: > { %p632_p2 = scmp.ge.s32.totalorder %s765_s23, 2  ;;  %s529_s12 = sand.u32 1, %s745_s18  }
 0x1f7   : > { %s530_s14 = scalar_lea.sflag [#allocation3], %s529_s12 }
 0x1f8   : > { %p629_p3 = pnand %p632_p2, %p849_p8 }
 0x1fa   : > { %740 = dma.done.wait (!%p629_p3), %s530_s14, 512  }
 0x1fb   : > { %742 = vsyncadd (!%p629_p3), %s530_s14, 4294966784  ;;  %s18_s23 = sadd.s32 1, %s765_s23   ;;  %s967_s18 = smov %s749_s19 }
 0x1fc   : > { %p15_p5 = scmp.ge.s32.totalorder %s18_s23, 4   ;;  %s968_s19 = smov %s753_s20 }
 0x1fd   : > { %s969_s20 = smov %s855_s6  ;;  %s970_s21 = smov %s761_s22 }
 0x1fe   : > { %s971_s22 = smov %s973_s26  ;;  %17 = sbr.rel (!%p15_p5) target bundleno = 4 (0x4), region = 75 }
 0x205   :  { %535 = vsyncpa [#allocation3], 1 }
 0x206   :  { %537 = vsyncpa [#allocation3 + $0x1], 1 }

</bundles_post_ra>
